<compile_context>
chip_gen: v6e
topology: v6e:2x2x1
jax: 0.10.0
libtpu: 0.0.40
codegen_flags: <defaults>
</compile_context>

<pallas_src>
import jax
import jax.numpy as jnp
from jax.experimental import pallas as pl
from jax.experimental.pallas import tpu as pltpu


def _readout_kernel(x_ref, m_ref, o_ref):
    """Pools one block of BB graphs.

    x_ref: (BB, N, D)  node embeddings, source dtype
    m_ref: (BB, N)     0/1 node mask, f32, lane-dense
    o_ref: (BB, D)     pooled graph embeddings, source dtype, lane/sublane-dense
    """
    m = m_ref[...]                                  # (BB, N) f32
    x = x_ref[...].astype(jnp.float32)              # (BB, N, D) f32 working copy

    # Masked sum over nodes: VPU broadcast-multiply + XLU sublane reduce, f32 accum.
    s = jnp.sum(x * m[:, :, None], axis=1)          # (BB, D)

    # Valid-node counts from the already-resident lane-dense mask.
    counts = jnp.sum(m, axis=1, keepdims=True)      # (BB, 1)
    inv = pl.reciprocal(jnp.maximum(counts, 1.0), approx=False)

    # Single dense (BB, D) store in the output dtype.
    o_ref[...] = (s * inv).astype(o_ref.dtype)


def _pick_block_batch(batch, num_nodes, hidden, itemsize):
    """Graphs per grid step.

    Targets ~2 MiB per x tile so the double-buffered input plus the in-kernel f32
    working copy stay comfortably under the default scoped-VMEM limits on every
    generation while still amortizing per-step overhead over many graphs. If the
    block is smaller than the batch it is a multiple of 8 (sublane-dense output)
    and yields multiple grid steps so both TensorCores get work on v7x; a
    full-batch block is always layout-legal.
    """
    target_bytes = 2 * 1024 * 1024
    per_graph = max(num_nodes * hidden * itemsize, 1)
    bb = max(8, min(128, (target_bytes // per_graph) // 8 * 8))
    return int(min(batch, bb))


def readout(x_dense, mask=None):
    """Masked mean-pool readout.

    Args:
      x_dense: (B, N, D) float array of node embeddings in dense batch format.
      mask:    optional (B, N) array (bool or float); 1/True marks valid nodes.

    Returns:
      (B, D) graph-level embeddings (same dtype as x_dense).
    """
    B, N, D = x_dense.shape
    if mask is None:
        mask = jnp.ones((B, N), dtype=jnp.float32)
    # 0/1 mask values are exact in f32; a lane-dense f32 block avoids bool-layout
    # headaches and costs only B*N*4 extra HBM bytes (negligible vs B*N*D).
    mask = mask.astype(jnp.float32)

    bb = _pick_block_batch(B, N, D, jnp.dtype(x_dense.dtype).itemsize)
    grid = (pl.cdiv(B, bb),)
    # Ragged tail blocks (when bb does not divide B) read garbage rows, but those
    # rows only affect their own (out-of-bounds) output rows, which Pallas drops
    # on writeback — no masking needed.

    out = pl.pallas_call(
        _readout_kernel,
        out_shape=jax.ShapeDtypeStruct((B, D), x_dense.dtype),
        grid_spec=pltpu.PrefetchScalarGridSpec(
            num_scalar_prefetch=0,
            grid=grid,
            in_specs=[
                pl.BlockSpec((bb, N, D), lambda i: (i, 0, 0)),  # x: BB graphs/step
                pl.BlockSpec((bb, N), lambda i: (i, 0)),        # mask: lane-dense f32
            ],
            out_specs=pl.BlockSpec((bb, D), lambda i: (i, 0)),  # dense (BB, D) block
        ),
        compiler_params=pltpu.CompilerParams(
            dimension_semantics=("parallel",),
            vmem_limit_bytes=32 * 1024 * 1024,
        ),
    )(x_dense, mask)
    return out


if __name__ == "__main__":
    key = jax.random.PRNGKey(0)
    B, N, D = 2, 8, 128  # small shapes: batch=2, max_nodes=8, hidden=128 (lane-dense)

    kx, _ = jax.random.split(key)
    x_dense = jax.random.normal(kx, (B, N, D), dtype=jnp.float32)

    # Deterministic variable-length node mask: graph 0 has 5 nodes, graph 1 has 8.
    lengths = jnp.array([5, 8], dtype=jnp.int32)
    mask = (jnp.arange(N)[None, :] < lengths[:, None]).astype(jnp.float32)

    out = jax.block_until_ready(readout(x_dense, mask))

    # Pure-JAX reference (masked mean pooling).
    m3 = mask[:, :, None]
    ref = (x_dense * m3).sum(axis=1) / jnp.maximum(m3.sum(axis=1), 1.0)
    assert out.shape == (B, D)
    assert jnp.allclose(out, ref, atol=1e-4, rtol=1e-4), "mismatch vs reference"

    # mask=None path: plain mean over all nodes.
    out_full = jax.block_until_ready(readout(x_dense))
    ref_full = x_dense.mean(axis=1)
    assert jnp.allclose(out_full, ref_full, atol=1e-4, rtol=1e-4), "mismatch (no mask)"

    print("KERNEL_OK")
</pallas_src>

<mosaic_0001>
module attributes {stable_mosaic.version = 11 : i64} {
  func.func @_readout_kernel(%arg0: i32, %arg1: memref<2x8x128xf32, #tpu.memory_space<vmem>>, %arg2: memref<2x8xf32, #tpu.memory_space<vmem>>, %arg3: memref<2x128xf32, #tpu.memory_space<vmem>>) attributes {dimension_semantics = [#tpu.dimension_semantics<parallel>], iteration_bounds = array<i64: 1>, scalar_prefetch = 0 : i64, scratch_operands = 0 : i64, tpu.core_type = #tpu.core_type<tc>, window_params = [{transform_indices = @transform_0, window_bounds = array<i64: 2, 8, 128>}, {transform_indices = @transform_1, window_bounds = array<i64: 2, 8>}, {transform_indices = @transform_2, window_bounds = array<i64: 2, 128>}]} {
    %c0 = arith.constant 0 : index
    %c0_0 = arith.constant 0 : index
    %0 = vector.load %arg2[%c0, %c0_0] : memref<2x8xf32, #tpu.memory_space<vmem>>, vector<2x8xf32>
    %c0_1 = arith.constant 0 : index
    %c0_2 = arith.constant 0 : index
    %c0_3 = arith.constant 0 : index
    %1 = vector.load %arg1[%c0_1, %c0_2, %c0_3] : memref<2x8x128xf32, #tpu.memory_space<vmem>>, vector<2x8x128xf32>
    %2 = vector.shape_cast %0 : vector<2x8xf32> to vector<2x8x1xf32>
    %3 = vector.broadcast %2 : vector<2x8x1xf32> to vector<2x8x128xf32>
    %4 = arith.mulf %1, %3 : vector<2x8x128xf32>
    %cst = arith.constant dense<0.000000e+00> : vector<2x128xf32>
    %5 = vector.multi_reduction <add>, %4, %cst [1] : vector<2x8x128xf32> to vector<2x128xf32>
    %cst_4 = arith.constant dense<0.000000e+00> : vector<2xf32>
    %6 = vector.multi_reduction <add>, %0, %cst_4 [1] : vector<2x8xf32> to vector<2xf32>
    %7 = vector.shape_cast %6 : vector<2xf32> to vector<2x1xf32>
    %cst_5 = arith.constant 1.000000e+00 : f32
    %8 = vector.broadcast %cst_5 : f32 to vector<2x1xf32>
    %9 = arith.maximumf %7, %8 : vector<2x1xf32>
    %10 = tpu.reciprocal %9 : vector<2x1xf32> -> vector<2x1xf32>
    %11 = vector.broadcast %10 : vector<2x1xf32> to vector<2x128xf32>
    %12 = arith.mulf %5, %11 : vector<2x128xf32>
    %c0_6 = arith.constant 0 : index
    %c0_7 = arith.constant 0 : index
    %13 = vector.load %arg3[%c0_6, %c0_7] : memref<2x128xf32, #tpu.memory_space<vmem>>, vector<2x128xf32>
    tpu.vector_store %arg3[%c0_6, %c0_7], %12 {strides = array<i32>} : memref<2x128xf32, #tpu.memory_space<vmem>>, vector<2x128xf32>,
    return
  }
  func.func @transform_0(%arg0: i32) -> (i32, i32, i32) {
    %c0_i32 = arith.constant 0 : i32
    %c0_i32_0 = arith.constant 0 : i32
    %c0_i32_1 = arith.constant 0 : i32
    return %arg0, %c0_i32, %c0_i32_0 : i32, i32, i32
  }
  func.func @transform_1(%arg0: i32) -> (i32, i32) {
    %c0_i32 = arith.constant 0 : i32
    %c0_i32_0 = arith.constant 0 : i32
    return %arg0, %c0_i32 : i32, i32
  }
  func.func @transform_2(%arg0: i32) -> (i32, i32) {
    %c0_i32 = arith.constant 0 : i32
    %c0_i32_0 = arith.constant 0 : i32
    return %arg0, %c0_i32 : i32, i32
  }
}

</mosaic_0001>

<bundles_post_ra>
// kernel: tpu_custom_call.1
= control target key start
LH: loop header
LB: loop body
LE: loop exit
PB: predicated region body
PF: predicated region fallthrough
CT: control target
= control target key end

     0   :  { %7 = vsyncpa [#allocation3], 0  ;;  %s206_s0 = inlined_call_operand.hbm [shape: f32[2,8,128], index: 0, kind: input, shape index: {}]   ;;  %s207_s1 = inlined_call_operand.hbm [shape: f32[2,8], index: 1, kind: input, shape index: {}]   ;;  %s208_s2 = inlined_call_operand.hbm [shape: f32[2,128], index: 2, kind: output, shape index: {}]  }
   0x1   :  { %8 = vsyncpa [#allocation6], 0 }
   0x2   :  { %9 = vsyncpa [#allocation4], 0  ;;  %s177_s9 = smov [#allocation2]  }
   0x3   :  { %s15_s10 = sshll.u32 %s177_s9, 4  ;;  %s16_s10 = int_to_ptr.vmem [resolvable:$true] %s15_s10 }
   0x4   :  { %s119_s11 = scalar_lea.vmem %s16_s10, 256  ;;  %p124_p1 = scmp.lt.s32.totalorder %s16_s10, %s16_s10 }
   0x5   :  { %p120_p0 = scmp.ne.s32.totalorder %s16_s10, %s119_s11  ;;  %p125_p2 = scmp.lt.s32.totalorder %s119_s11, %s119_s11 }
   0x7   :  { %p126_p3 = por %p125_p2, %p124_p1 }
   0x9   :  { %p127_p4 = pnand %p126_p3, %p120_p0 }
   0xb   :  { %130 = shalt.err (!%p127_p4)
}
   0xc   :  { %s178_s12 = smov 128   ;;  %s179_s13 = smov 8  }
   0xd   :  { %21 = dma.hbm_to_vmem [thread:$0]  %s206_s0, 256, %s16_s10, [#allocation3], %s178_s12, %s178_s12, %s179_s13  }
   0xe   :  { %s180_s16 = smov [#allocation5]  }
   0xf   :  { %s28_s17 = sshll.u32 %s180_s16, 4  ;;  %s29_s17 = int_to_ptr.vmem [resolvable:$true] %s28_s17 }
  0x10   :  { %s139_s18 = scalar_lea.vmem %s29_s17, 32  ;;  %p144_p6 = scmp.lt.s32.totalorder %s29_s17, %s29_s17 }
  0x11   :  { %p140_p5 = scmp.ne.s32.totalorder %s29_s17, %s139_s18  ;;  %p145_p7 = scmp.lt.s32.totalorder %s139_s18, %s139_s18 }
  0x13   :  { %p146_p8 = por %p145_p7, %p144_p6 }
  0x15   :  { %p147_p9 = pnand %p146_p8, %p140_p5 }
  0x17   :  { %150 = shalt.err (!%p147_p9)
}
  0x18   :  { %31 = dma.hbm_to_vmem [thread:$0]  %s207_s1, 32, %s29_s17, [#allocation6]  }
  0x19   :  { %171 = dma.done.wait [#allocation3], 256  }
  0x1a   :  { %172 = vsyncadd [#allocation3], 4294967040 }
  0x1b   :  { %173 = dma.done.wait [#allocation6], 32  }
  0x1c   :  { %174 = vsyncadd [#allocation6], 4294967264  ;;  %v41_v0 = vlaneseq  ;;  %vm69_vm0 = vcmask 58368   ;;  %v38_v3 = vld [vmem:[#allocation5] sm:$0x3]  ;;  %v39_v8 = vld [vmem:[#allocation2] sm:$0xff] }
  0x1d   :  { %v70_v4 = vsel %vm69_vm0, %v38_v3, 0.0  ;;  %v40_v14 = vld [vmem:[#allocation2 + $0x8] sm:$0xff]  ;;  %s181_s0 = smov [#allocation7]   ;;  %vm84_vm1 = vcmask 1041409  }
  0x1e   :  { %v42_v1 = vshrl.u32 %v41_v0, 7  ;;  %71 = vadd.xlane.f32.xlu0 %v70_v4  ;;  %s94_s1 = sshll.u32 %s181_s0, 4  ;;  %s95_s1 = int_to_ptr.vmem [resolvable:$true] %s94_s1 }
  0x1f   :  { %s151_s21 = scalar_lea.vmem %s95_s1, 32  ;;  %p156_p11 = scmp.lt.s32.totalorder %s95_s1, %s95_s1 }
  0x20   :  { %v43_v2 = vsub.s32 0, %v42_v1  ;;  %v50_v6 = vsub.s32 1, %v42_v1  ;;  %p152_p10 = scmp.ne.s32.totalorder %s95_s1, %s151_s21  ;;  %p157_p12 = scmp.lt.s32.totalorder %s151_s21, %s151_s21 }
  0x22   :  { %v44_v5 = vrot.slane %v38_v3, %v43_v2  ;;  %v51_v7 = vrot.slane %v38_v3, %v50_v6  ;;  %p158_p13 = por %p157_p12, %p156_p11 }
  0x24   :  { %46 = vbcast.lane.b32.xlu1 %v44_v5, 256  ;;  %p159_p0 = pnand %p158_p13, %p152_p10 }
  0x34   :  { %53 = vbcast.lane.b32.xlu0 %v51_v7, 256 }
  0x96   :  { %v47_v9 = vpop.permute.xlu1 %46 }
  0x97   :  { %v55_v10 = vmul.f32 %v47_v9, %v39_v8 }
  0x99   :  { %v57_v11 = vrot.slane %v55_v10, 4 }
  0x9b   :  { %v58_v15 = vadd.f32 %v57_v11, %v55_v10 }
  0x9d   :  { %v59_v18 = vrot.slane %v58_v15, 2 }
  0x9f   :  { %v60_v21 = vadd.f32 %v59_v18, %v58_v15 }
  0xa1   :  { %v61_v24 = vrot.slane %v60_v21, 1 }
  0xa3   :  { %v62_v29 = vadd.f32 %v61_v24, %v60_v21 }
  0xa7   :  { %v72_v12 = vpop.xlane.xlu0 %71 }
  0xa8   :  { %v73_v13 = vmax.f32 %v72_v12, 1.0 }
  0xaa   :  { %109 = vrcp.f32 %v73_v13 }
  0xab   :  { %v54_v16 = vpop.permute.xlu0 %53 }
  0xac   :  { %v56_v17 = vmul.f32 %v54_v16, %v40_v14 }
  0xae   :  { %v63_v19 = vrot.slane %v56_v17, 4 }
  0xb0   :  { %v64_v20 = vadd.f32 %v63_v19, %v56_v17 }
  0xb2   :  { %v65_v22 = vrot.slane %v64_v20, 2 }
  0xb4   :  { %v66_v23 = vadd.f32 %v65_v22, %v64_v20 }
  0xb6   :  { %v67_v25 = vrot.slane %v66_v23, 1 }
  0xb7   :  { %v110_v26 = vpop.eup %109 }
  0xb8   :  { %v68_v27 = vadd.f32 %v67_v25, %v66_v23  ;;  %v76_v28 = vrot.slane %v110_v26, 1  ;;  %v79_v31 = vmul.f32 %v110_v26, %v62_v29 }
  0xba   :  { %v80_v30 = vmul.f32 %v76_v28, %v68_v27 }
  0xbc   :  { %v83_v32 = vrot.slane %v80_v30, 7 }
  0xbe   :  { %v85_v33 = vsel %vm84_vm1, %v83_v32, %v79_v31 }
  0xbf   :  { %87 = vst [vmem:[#allocation7] sm:$0x3] %v85_v33 }
  0xc0   :  { %162 = shalt.err (!%p159_p0)
}
  0xc1   :  { %97 = dma.vmem_to_hbm [thread:$0]  %s95_s1, 32, %s208_s2, [#allocation4]  }
  0xc2   :  { %175 = dma.done.wait [#allocation4], 32  }
  0xc3   :  { %176 = vsyncadd [#allocation4], 4294967264 }
  0xc4   :  { %101 = vsyncpa [#allocation3], 1 }
  0xc5   :  { %102 = vsyncpa [#allocation6], 1 }
  0xc6   :  { %103 = vsyncpa [#allocation4], 1 }

</bundles_post_ra>
